<compile_context>
chip_gen: v7x
topology: tpu7x:2x2x1
jax: 0.10.0
libtpu: 0.0.40
codegen_flags: <defaults>
</compile_context>

<pallas_src>
import functools

import jax
import jax.numpy as jnp
from jax import lax
from jax.experimental import pallas as pl
from jax.experimental.pallas import tpu as pltpu


def _round_up(x, m):
    return ((x + m - 1) // m) * m


# ----------------------------------------------------------------------------
# Kernel 1: tiled linear (+ optional LeakyReLU). bf16 operands, f32 accumulate.
# ----------------------------------------------------------------------------
def _linear_kernel(x_ref, w_ref, b_ref, o_ref, *, slope):
    y = jnp.dot(x_ref[...], w_ref[...], preferred_element_type=jnp.float32)
    y = y + b_ref[...]
    if slope is not None:                      # LeakyReLU(negative_slope=slope)
        y = jnp.where(y >= 0, y, slope * y)
    o_ref[...] = y.astype(o_ref.dtype)


def linear_pallas(x, w, b, *, leaky_slope=None, out_dtype=jnp.float32, tile_m=512):
    """y = act(x @ w + b).  x:(M,K) w:(K,N) b:(N,).  Tiled/pipelined over M."""
    M, K = x.shape
    N = w.shape[1]
    xb = x.astype(jnp.bfloat16)
    wb = w.astype(jnp.bfloat16)
    b2 = b.reshape(1, N).astype(jnp.float32)
    TM = min(tile_m, _round_up(M, 8))
    Mp = _round_up(M, TM)
    if Mp != M:
        xb = jnp.pad(xb, ((0, Mp - M), (0, 0)))
    out = pl.pallas_call(
        functools.partial(_linear_kernel, slope=leaky_slope),
        out_shape=jax.ShapeDtypeStruct((Mp, N), out_dtype),
        grid=(Mp // TM,),
        in_specs=[
            pl.BlockSpec((TM, K), lambda i: (i, 0)),
            pl.BlockSpec((K, N), lambda i: (0, 0)),   # constant index -> DMA'd once
            pl.BlockSpec((1, N), lambda i: (0, 0)),
        ],
        out_specs=pl.BlockSpec((TM, N), lambda i: (i, 0)),
        compiler_params=pltpu.CompilerParams(
            dimension_semantics=("parallel",)),
    )(xb, wb, b2)
    return out if Mp == M else out[:M]


# ----------------------------------------------------------------------------
# Kernel 2: bidirectional mask-gated LSTM recurrence, chunked over time.
# Each grid step advances both directions by TC timesteps; h/c state lives in
# VMEM scratch; W_hh stays resident (constant block index, bf16).
# ----------------------------------------------------------------------------
def _bilstm_chunk_kernel(xpf_ref, xpb_ref, mf_ref, mb_ref, whf_ref, whb_ref,
                         of_ref, ob_ref, hf_ref, cf_ref, hb_ref, cb_ref,
                         hf_sc, cf_sc, hb_sc, cb_sc, *, H, TC):
    @pl.when(pl.program_id(0) == 0)
    def _():
        for r in (hf_sc, cf_sc, hb_sc, cb_sc):
            r[...] = jnp.zeros_like(r)

    whf = whf_ref[...]                                 # (H, 4H) bf16, resident
    whb = whb_ref[...]

    def cell(xp, m, h, c, whh):
        gates = xp.astype(jnp.float32) + jnp.dot(
            h.astype(jnp.bfloat16), whh, preferred_element_type=jnp.float32)
        i = jax.nn.sigmoid(gates[:, 0 * H:1 * H])      # PyTorch gate order i,f,g,o
        f = jax.nn.sigmoid(gates[:, 1 * H:2 * H])
        g = jnp.tanh(gates[:, 2 * H:3 * H])
        o = jax.nn.sigmoid(gates[:, 3 * H:4 * H])
        c_new = f * c + i * g
        h_new = o * jnp.tanh(c_new)
        h_out = m * h_new + (1.0 - m) * h              # packed-sequence gating
        c_out = m * c_new + (1.0 - m) * c
        return h_out, c_out, m * h_new

    # Unrolled chunk loop (static indices): both directions advanced per step so
    # the two small (B,H)x(H,4H) MXU dots overlap with VPU/EUP gate math.
    for s in range(TC):
        r = TC - 1 - s                                 # backward local index
        xf = xpf_ref[:, s:s + 1, :][:, 0, :]
        xb = xpb_ref[:, r:r + 1, :][:, 0, :]
        mf = mf_ref[:, s:s + 1, :][:, 0, :]
        mb = mb_ref[:, r:r + 1, :][:, 0, :]
        hf, cf, of = cell(xf, mf, hf_sc[...], cf_sc[...], whf)
        hb, cb, ob = cell(xb, mb, hb_sc[...], cb_sc[...], whb)
        hf_sc[...] = hf
        cf_sc[...] = cf
        hb_sc[...] = hb
        cb_sc[...] = cb
        of_ref[:, s:s + 1, :] = of[:, None, :].astype(of_ref.dtype)
        ob_ref[:, r:r + 1, :] = ob[:, None, :].astype(ob_ref.dtype)

    hf_ref[...] = hf_sc[...]
    cf_ref[...] = cf_sc[...]
    hb_ref[...] = hb_sc[...]
    cb_ref[...] = cb_sc[...]


def lstm_bidir_pallas(x, mask, layer, *, chunk=32):
    """One BiLSTM layer over batch-first x:(B,T,D) with validity mask:(B,T).

    layer = {"wih": (D,8H) bf16, "bih": (8H,), "whf": (H,4H) bf16, "whb": (H,4H) bf16}
    Returns (outputs (B,T,2H) bf16, zeroed at padded steps, and final
    (h_f, c_f, h_b, c_b) states). Assumes right-padded sequences."""
    B, T, D = x.shape
    H = layer["whf"].shape[0]

    if T <= chunk:
        TC, Tp = T, T
    else:
        TC = chunk
        Tp = _round_up(T, TC)
    if Tp != T:
        x = jnp.pad(x, ((0, 0), (0, Tp - T), (0, 0)))
        mask = jnp.pad(mask, ((0, 0), (0, Tp - T)))

    # Fused fwd|bwd input projection: one lane-dense (B*Tp, 8H) bf16 slab.
    xp = linear_pallas(x.reshape(B * Tp, D), layer["wih"], layer["bih"],
                       out_dtype=jnp.bfloat16)
    xp = xp.reshape(B, Tp, 8 * H)
    m = mask.astype(jnp.float32).reshape(B, Tp, 1)

    nc = Tp // TC
    fwd_t = lambda c: (0, c, 0)
    bwd_t = lambda c: (0, nc - 1 - c, 0)
    const = lambda c: (0, 0)

    out_shape = (
        jax.ShapeDtypeStruct((B, Tp, H), jnp.bfloat16),   # out_f
        jax.ShapeDtypeStruct((B, Tp, H), jnp.bfloat16),   # out_b
        jax.ShapeDtypeStruct((B, H), jnp.float32),        # h_f final
        jax.ShapeDtypeStruct((B, H), jnp.float32),        # c_f final
        jax.ShapeDtypeStruct((B, H), jnp.float32),        # h_b final
        jax.ShapeDtypeStruct((B, H), jnp.float32),        # c_b final
    )
    out_f, out_b, h_f, c_f, h_b, c_b = pl.pallas_call(
        functools.partial(_bilstm_chunk_kernel, H=H, TC=TC),
        out_shape=out_shape,
        grid=(nc,),
        in_specs=[
            pl.BlockSpec((B, TC, 4 * H), lambda c: (0, c, 0)),            # fwd gate cols
            pl.BlockSpec((B, TC, 4 * H), lambda c: (0, nc - 1 - c, 1)),   # bwd gate cols
            pl.BlockSpec((B, TC, 1), fwd_t),
            pl.BlockSpec((B, TC, 1), bwd_t),
            pl.BlockSpec((H, 4 * H), const),
            pl.BlockSpec((H, 4 * H), const),
        ],
        out_specs=[
            pl.BlockSpec((B, TC, H), fwd_t),
            pl.BlockSpec((B, TC, H), bwd_t),
            pl.BlockSpec((B, H), const),
            pl.BlockSpec((B, H), const),
            pl.BlockSpec((B, H), const),
            pl.BlockSpec((B, H), const),
        ],
        scratch_shapes=[pltpu.VMEM((B, H), jnp.float32)] * 4,
        compiler_params=pltpu.CompilerParams(
            dimension_semantics=("arbitrary",)),
    )(xp, xp, m, m, layer["whf"], layer["whb"])

    out = jnp.concatenate([out_f, out_b], axis=-1)
    if Tp != T:
        out = out[:, :T]
    return out, (h_f, c_f, h_b, c_b)


def bilstm(layers, x, mask):
    """3-layer BiLSTM (eval mode: no SharedDropout)."""
    for layer in layers:
        x, _ = lstm_bidir_pallas(x, mask, layer)
    return x


def char_embeddings(params, chars):
    """CharacterEmbeddings: per-word bidirectional char-LSTM final hidden states."""
    B, L, W = chars.shape
    cf = chars.reshape(B * L, W)
    emb = jnp.take(params["char_embed"], cf, axis=0)           # (B*L, W, E)
    mask_c = (cf != 0)
    _, (h_f, _, h_b, _) = lstm_bidir_pallas(emb, mask_c, params["char_lstm_prep"])
    h = jnp.concatenate([h_f, h_b], axis=-1)                   # zero rows for all-pad words
    return h.reshape(B, L, -1)


# ----------------------------------------------------------------------------
# Kernel 3/4: biaffine attentions (bias columns folded into the weights;
# operands picked out of the fused MLP activation via BlockSpec column blocks).
# ----------------------------------------------------------------------------
def _biaffine_arc_kernel(x_ref, y_ref, w_ref, b_ref, m_ref, o_ref):
    xw = jnp.dot(x_ref[0], w_ref[...], preferred_element_type=jnp.float32)
    xw = (xw + b_ref[...]).astype(jnp.bfloat16)                # (Lp, DP)
    s = lax.dot_general(xw, y_ref[0], (((1,), (1,)), ((), ())),
                        preferred_element_type=jnp.float32)    # (Lp, Lp)
    o_ref[0] = s + m_ref[0]                                    # additive -inf head mask


def biaffine_arc(act, w_main, w_bias, head_mask, *, dp, d_blk, h_blk):
    B, Lp, _ = act.shape
    amask = jnp.where(head_mask, 0.0, -jnp.inf).astype(jnp.float32).reshape(B, 1, Lp)
    return pl.pallas_call(
        _biaffine_arc_kernel,
        out_shape=jax.ShapeDtypeStruct((B, Lp, Lp), jnp.float32),
        grid=(B,),
        in_specs=[
            pl.BlockSpec((1, Lp, dp), lambda b: (b, 0, d_blk)),   # arc_d columns
            pl.BlockSpec((1, Lp, dp), lambda b: (b, 0, h_blk)),   # arc_h columns
            pl.BlockSpec((dp, dp), lambda b: (0, 0)),
            pl.BlockSpec((1, dp), lambda b: (0, 0)),
            pl.BlockSpec((1, 1, Lp), lambda b: (b, 0, 0)),
        ],
        out_specs=pl.BlockSpec((1, Lp, Lp), lambda b: (b, 0, 0)),
        compiler_params=pltpu.CompilerParams(dimension_semantics=("parallel",)),
    )(act, act, w_main, w_bias, amask)


def _biaffine_rel_kernel(x_ref, y_ref, w_ref, b_ref, o_ref, *, n_out, dp, bias_lane):
    # One lane-dense matmul over all n_out relation matrices at once.
    xw = jnp.dot(x_ref[0], w_ref[...], preferred_element_type=jnp.float32)
    xw = (xw + b_ref[...]).astype(jnp.bfloat16)                # (TL, n_out*dp)
    y = y_ref[0]                                               # (Lp, dp) bf16
    lane = lax.broadcasted_iota(jnp.int32, y.shape, 1)
    y = jnp.where(lane == bias_lane, jnp.asarray(1.0, y.dtype), y)   # bias_y column, in bf16
    yT = y.T                                                   # one transpose reused over n_out dots
    for o in range(n_out):
        s = jnp.dot(xw[:, o * dp:(o + 1) * dp], yT,
                    preferred_element_type=jnp.float32)        # (TL, Lp)
        o_ref[:, o:o + 1] = s[None, None]


def biaffine_rel(act, w_main, w_bias, *, dp, d_blk, h_blk, n_out, bias_lane,
                 tile_l=128):
    B, Lp, _ = act.shape
    TL = min(tile_l, Lp)
    return pl.pallas_call(
        functools.partial(_biaffine_rel_kernel, n_out=n_out, dp=dp,
                          bias_lane=bias_lane),
        out_shape=jax.ShapeDtypeStruct((B, n_out, Lp, Lp), jnp.float32),
        grid=(B, Lp // TL),                                    # dep-row tiling (VMEM headroom)
        in_specs=[
            pl.BlockSpec((1, TL, dp), lambda b, i: (b, i, d_blk)),   # rel_d columns
            pl.BlockSpec((1, Lp, dp), lambda b, i: (b, 0, h_blk)),   # rel_h columns
            pl.BlockSpec((dp, n_out * dp), lambda b, i: (0, 0)),
            pl.BlockSpec((1, n_out * dp), lambda b, i: (0, 0)),
        ],
        out_specs=pl.BlockSpec((1, n_out, TL, Lp), lambda b, i: (b, 0, i, 0)),
        compiler_params=pltpu.CompilerParams(
            dimension_semantics=("parallel", "parallel"),
            vmem_limit_bytes=48 * 1024 * 1024),
    )(act, act, w_main, w_bias)


# ----------------------------------------------------------------------------
# Weight preparation: fuse/pad MLP heads, fold biaffine bias rows, fuse LSTM
# fwd|bwd input projections, transpose W_hh into resident bf16 slabs.
# ----------------------------------------------------------------------------
def _prep_bilstm_layer(fw, bw):
    """fw/bw = (w_ih (4H,D), w_hh (4H,H), b_ih (4H,), b_hh (4H,))."""
    wih = jnp.concatenate([fw[0].T, bw[0].T], axis=1)          # (D, 8H)
    bih = jnp.concatenate([fw[2] + fw[3], bw[2] + bw[3]])      # (8H,)
    return {"wih": wih.astype(jnp.bfloat16),
            "bih": bih.astype(jnp.float32),
            "whf": fw[1].T.astype(jnp.bfloat16),               # (H, 4H)
            "whb": bw[1].T.astype(jnp.bfloat16)}


def prepare_params(p, cfg):
    H2 = cfg["lstm_hidden_dim"] * 2
    arc, rel, O = cfg["arc_mlp"], cfg["rel_mlp"], cfg["n_ner"]
    ADP = _round_up(arc, 128)          # 500 -> 512
    RDP = _round_up(rel, 128)          # 100 -> 128
    NF = 2 * ADP + 2 * RDP             # 1280

    p = dict(p)
    p["lstm_prep"] = [_prep_bilstm_layer(l["f"], l["b"]) for l in p["lstm"]]
    p["char_lstm_prep"] = _prep_bilstm_layer(p["char_lstm_f"], p["char_lstm_b"])

    wf = jnp.zeros((H2, NF), jnp.float32)
    bf = jnp.zeros((NF,), jnp.float32)
    offs = [0, ADP, 2 * ADP, 2 * ADP + RDP]
    names = ["mlp_arc_d", "mlp_arc_h", "mlp_rel_d", "mlp_rel_h"]
    widths = [arc, arc, rel, rel]
    for off, name, wdt in zip(offs, names, widths):
        w, b = p[name]
        wf = wf.at[:, off:off + wdt].set(w.T)
        bf = bf.at[off:off + wdt].set(b)
    p["mlp_fused_w"] = wf.astype(jnp.bfloat16)
    p["mlp_fused_b"] = bf

    # Arc biaffine (bias_x only): W (1, arc+1, arc) -> padded main + bias row.
    aw = p["arc_attn_w"][0]
    awm = jnp.zeros((ADP, ADP), jnp.float32).at[:arc, :arc].set(aw[:arc, :])
    awb = jnp.zeros((1, ADP), jnp.float32).at[0, :arc].set(aw[arc, :])
    p["arc_w_main"] = awm.astype(jnp.bfloat16)
    p["arc_w_bias"] = awb

    # Rel biaffine (bias_x and bias_y): W (O, rel+1, rel+1) fused over O.
    rw = p["rel_attn_w"]
    rwm = jnp.zeros((RDP, O, RDP), jnp.float32)
    rwm = rwm.at[:rel, :, :rel + 1].set(jnp.transpose(rw[:, :rel, :], (1, 0, 2)))
    rwb = jnp.zeros((O, RDP), jnp.float32).at[:, :rel + 1].set(rw[:, rel, :])
    p["rel_w_main"] = rwm.reshape(RDP, O * RDP).astype(jnp.bfloat16)
    p["rel_w_bias"] = rwb.reshape(1, O * RDP)

    p["_dims"] = dict(ADP=ADP, RDP=RDP, NF=NF, arc=arc, rel=rel, O=O)
    return p


# ----------------------------------------------------------------------------
# Full forward pass
# ----------------------------------------------------------------------------
def forward(params, words, chars, pos_tags, phrases, ner_tags, mask):
    word_e = jnp.take(params["word_embed"], words, axis=0)
    char_e = char_embeddings(params, chars)
    pos_e = jnp.take(params["pos_embed"], pos_tags, axis=0)
    phr_e = jnp.take(params["phrase_embed"], phrases, axis=0)
    ner_e = jnp.take(params["ner_embed"], ner_tags, axis=0)
    # IndependentDropout: identity in eval mode.
    embed = jnp.concatenate([word_e, char_e, pos_e, phr_e, ner_e], axis=-1)

    x = bilstm(params["lstm_prep"], embed, mask)         # (B, L, 2*lstm_hidden) bf16
    # SharedDropout (lstm_dropout): identity in eval mode.

    d = params["_dims"]
    B, L, D2 = x.shape
    # Single fused projection for all four MLP heads (LeakyReLU fused in).
    act = linear_pallas(x.reshape(B * L, D2), params["mlp_fused_w"],
                        params["mlp_fused_b"], leaky_slope=0.1,
                        out_dtype=jnp.bfloat16, tile_m=512)
    act = act.reshape(B, L, d["NF"])                     # (B, L, 1280) bf16

    # Pad the sequence axis to a multiple of 128 -> lane-dense biaffine stores.
    Lp = _round_up(L, 128)
    if Lp != L:
        act = jnp.pad(act, ((0, 0), (0, Lp - L), (0, 0)))
        mask_p = jnp.pad(mask, ((0, 0), (0, Lp - L)))
    else:
        mask_p = mask

    s_arc = biaffine_arc(act, params["arc_w_main"], params["arc_w_bias"], mask_p,
                         dp=d["ADP"], d_blk=0, h_blk=1)
    s_rel = biaffine_rel(act, params["rel_w_main"], params["rel_w_bias"],
                         dp=d["RDP"],
                         d_blk=(2 * d["ADP"]) // d["RDP"],
                         h_blk=(2 * d["ADP"] + d["RDP"]) // d["RDP"],
                         n_out=d["O"], bias_lane=d["rel"])

    s_arc = s_arc[:, :L, :L]
    # TODO(synk): the (B,L,L,n_ner) permute (5-lane last dim) is required by the
    #             module spec; defer it to the API boundary if downstream can
    #             consume (B, n_ner, L, L) directly.
    s_rel = jnp.transpose(s_rel[:, :, :L, :L], (0, 2, 3, 1))
    return s_arc, s_rel


# ----------------------------------------------------------------------------
# Deterministic parameter init (shapes follow the module's __init__)
# ----------------------------------------------------------------------------
def init_params(key, cfg):
    keys = iter(jax.random.split(key, 100))

    def nrm(shape, scale=0.1):
        return (scale * jax.random.normal(next(keys), shape)).astype(jnp.float32)

    def emb(n, d):
        e = nrm((n, d), 1.0)
        return e.at[0].set(0.0)          # padding_idx = 0

    def lstm_dir(in_dim, hid):
        return (nrm((4 * hid, in_dim)), nrm((4 * hid, hid)),
                nrm((4 * hid,)), nrm((4 * hid,)))

    p = {}
    p["word_embed"] = emb(cfg["n_words"], cfg["word_embed_dim"])
    p["char_embed"] = emb(cfg["n_chars"], cfg["char_embed_dim"])
    p["pos_embed"] = emb(cfg["n_pos"], cfg["pos_embed_dim"])
    p["phrase_embed"] = emb(cfg["n_phrases"], cfg["phrase_embed_dim"])
    p["ner_embed"] = emb(cfg["n_ner"], cfg["ner_embed_dim"])

    Hc = cfg["char_hidden_dim"] // 2
    p["char_lstm_f"] = lstm_dir(cfg["char_embed_dim"], Hc)
    p["char_lstm_b"] = lstm_dir(cfg["char_embed_dim"], Hc)

    H = cfg["lstm_hidden_dim"]
    in_dim = (cfg["word_embed_dim"] + cfg["char_hidden_dim"] + cfg["pos_embed_dim"]
              + cfg["phrase_embed_dim"] + cfg["ner_embed_dim"])
    layers = []
    d = in_dim
    for _ in range(cfg["num_lstm_layers"]):
        layers.append({"f": lstm_dir(d, H), "b": lstm_dir(d, H)})
        d = 2 * H
    p["lstm"] = layers

    def lin(n_in, n_out):
        return (nrm((n_out, n_in)), jnp.zeros((n_out,), jnp.float32))

    p["mlp_arc_d"] = lin(2 * H, cfg["arc_mlp"])
    p["mlp_arc_h"] = lin(2 * H, cfg["arc_mlp"])
    p["mlp_rel_d"] = lin(2 * H, cfg["rel_mlp"])
    p["mlp_rel_h"] = lin(2 * H, cfg["rel_mlp"])
    # Biaffine weights (reference init is zeros; use small random for a non-trivial test)
    p["arc_attn_w"] = nrm((1, cfg["arc_mlp"] + 1, cfg["arc_mlp"]))          # bias_x only
    p["rel_attn_w"] = nrm((cfg["n_ner"], cfg["rel_mlp"] + 1, cfg["rel_mlp"] + 1))
    return p


# ----------------------------------------------------------------------------
if __name__ == "__main__":
    cfg = dict(
        n_words=50, n_chars=30, n_pos=12, n_phrases=12, n_ner=5,
        word_embed_dim=64, char_embed_dim=32, char_hidden_dim=64,
        pos_embed_dim=32, phrase_embed_dim=32, ner_embed_dim=32,
        lstm_hidden_dim=128, num_lstm_layers=3,
        arc_mlp=500, rel_mlp=100,       # hardcoded in the reference module
    )

    root = jax.random.PRNGKey(0)
    k_param, k_data = jax.random.split(root)
    params = prepare_params(init_params(k_param, cfg), cfg)

    B, L, W = 2, 8, 6
    kd = jax.random.split(k_data, 8)
    lengths = jnp.array([8, 5], dtype=jnp.int32)
    pos_idx = jnp.arange(L)[None, :]
    valid = pos_idx < lengths[:, None]                               # (B, L) bool

    words = jax.random.randint(kd[0], (B, L), 1, cfg["n_words"])
    words = jnp.where(valid, words, 0).astype(jnp.int32)
    mask = words != 0

    chars_raw = jax.random.randint(kd[1], (B, L, W), 1, cfg["n_chars"])
    char_lens = jax.random.randint(kd[2], (B, L), 1, W + 1)
    char_lens = jnp.where(valid, char_lens, 0)
    chars = jnp.where(jnp.arange(W)[None, None, :] < char_lens[:, :, None],
                      chars_raw, 0).astype(jnp.int32)

    pos_tags = jnp.where(valid, jax.random.randint(kd[3], (B, L), 1, cfg["n_pos"]), 0).astype(jnp.int32)
    phrases = jnp.where(valid, jax.random.randint(kd[4], (B, L), 1, cfg["n_phrases"]), 0).astype(jnp.int32)
    ner_tags = jnp.where(valid, jax.random.randint(kd[5], (B, L), 1, cfg["n_ner"]), 0).astype(jnp.int32)

    s_arc, s_rel = forward(params, words, chars, pos_tags, phrases, ner_tags, mask)
    jax.block_until_ready((s_arc, s_rel))

    assert s_arc.shape == (B, L, L)
    assert s_rel.shape == (B, L, L, cfg["n_ner"])
    assert bool(jnp.isfinite(s_rel).all())
    assert bool(jnp.isfinite(s_arc[0]).all())     # batch 0 is full length -> no -inf
    print("KERNEL_OK")
</pallas_src>

<mosaic_0001>
module attributes {stable_mosaic.version = 11 : i64} {
  func.func @_linear_kernel(%arg0: i32, %arg1: memref<96x32xbf16, #tpu.memory_space<vmem>>, %arg2: memref<32x256xbf16, #tpu.memory_space<vmem>>, %arg3: memref<1x256xf32, #tpu.memory_space<vmem>>, %arg4: memref<96x256xbf16, #tpu.memory_space<vmem>>) attributes {dimension_semantics = [#tpu.dimension_semantics<parallel>], iteration_bounds = array<i64: 1>, scalar_prefetch = 0 : i64, scratch_operands = 0 : i64, tpu.core_type = #tpu.core_type<tc>, window_params = [{transform_indices = @transform_0, window_bounds = array<i64: 96, 32>}, {pipeline_mode = #tpu.pipeline_mode<synchronous>, transform_indices = @transform_1, window_bounds = array<i64: 32, 256>}, {pipeline_mode = #tpu.pipeline_mode<synchronous>, transform_indices = @transform_2, window_bounds = array<i64: 1, 256>}, {transform_indices = @transform_3, window_bounds = array<i64: 96, 256>}]} {
    %c0 = arith.constant 0 : index
    %c0_0 = arith.constant 0 : index
    %0 = vector.load %arg1[%c0, %c0_0] : memref<96x32xbf16, #tpu.memory_space<vmem>>, vector<96x32xbf16>
    %c0_1 = arith.constant 0 : index
    %c0_2 = arith.constant 0 : index
    %1 = vector.load %arg2[%c0_1, %c0_2] : memref<32x256xbf16, #tpu.memory_space<vmem>>, vector<32x256xbf16>
    %cst = arith.constant dense<0.000000e+00> : vector<96x256xf32>
    %2 = tpu.matmul %0, %1, %cst {dimension_numbers = #tpu.dot_dimension_numbers<[1], [0], [0], [1], [0, 0, 1, 1], [], []>} : vector<96x32xbf16>, vector<32x256xbf16>, vector<96x256xf32> -> vector<96x256xf32>
    %c0_3 = arith.constant 0 : index
    %c0_4 = arith.constant 0 : index
    %3 = vector.load %arg3[%c0_3, %c0_4] : memref<1x256xf32, #tpu.memory_space<vmem>>, vector<1x256xf32>
    %4 = vector.broadcast %3 : vector<1x256xf32> to vector<96x256xf32>
    %5 = arith.addf %2, %4 : vector<96x256xf32>
    %6 = arith.truncf %5 : vector<96x256xf32> to vector<96x256xbf16>
    %c0_5 = arith.constant 0 : index
    %c0_6 = arith.constant 0 : index
    %7 = vector.load %arg4[%c0_5, %c0_6] : memref<96x256xbf16, #tpu.memory_space<vmem>>, vector<96x256xbf16>
    tpu.vector_store %arg4[%c0_5, %c0_6], %6 {strides = array<i32>} : memref<96x256xbf16, #tpu.memory_space<vmem>>, vector<96x256xbf16>,
    return
  }
  func.func @transform_0(%arg0: i32) -> (i32, i32) {
    %c0_i32 = arith.constant 0 : i32
    %c0_i32_0 = arith.constant 0 : i32
    return %arg0, %c0_i32 : i32, i32
  }
  func.func @transform_1(%arg0: i32) -> (i32, i32) {
    %c0_i32 = arith.constant 0 : i32
    %c0_i32_0 = arith.constant 0 : i32
    %c0_i32_1 = arith.constant 0 : i32
    return %c0_i32, %c0_i32_0 : i32, i32
  }
  func.func @transform_2(%arg0: i32) -> (i32, i32) {
    %c0_i32 = arith.constant 0 : i32
    %c0_i32_0 = arith.constant 0 : i32
    %c0_i32_1 = arith.constant 0 : i32
    return %c0_i32, %c0_i32_0 : i32, i32
  }
  func.func @transform_3(%arg0: i32) -> (i32, i32) {
    %c0_i32 = arith.constant 0 : i32
    %c0_i32_0 = arith.constant 0 : i32
    return %arg0, %c0_i32 : i32, i32
  }
}

</mosaic_0001>

<bundles_post_ra>
// kernel: tpu_custom_call.1
= control target key start
LH: loop header
LB: loop body
LE: loop exit
PB: predicated region body
PF: predicated region fallthrough
CT: control target
= control target key end

     0   :  { %v390_v2 = vmov 0   ;;  %vm94_vm0 = vcmask 261120   ;;  %s487_s0 = inlined_call_operand.vmem [shape: bf16[96,32], index: 0, kind: input, shape index: {}]   ;;  %s488_s1 = inlined_call_operand.vmem [shape: bf16[32,256], index: 1, kind: input, shape index: {}]   ;;  %s489_s2 = inlined_call_operand.vmem [shape: f32[1,256], index: 2, kind: input, shape index: {}]   ;;  %s490_s3 = inlined_call_operand.hbm [shape: bf16[96,256], index: 3, kind: output, shape index: {}]  }
   0x1   :  { %v354_v0 = vld [vmem:[%s488_s1 + $0x4] ss:$8 sps:$4 sm:$0xff]   ;;  %v356_v1 = vld [vmem:[%s488_s1] ss:$8 sps:$4 sm:$0xff]   ;;  %145 = vmatprep.mubr.bf16.mxu0 %v390_v2  ;;  %175 = vmatprep.mubr.bf16.mxu1 %v390_v2  ;;  %v357_v3 = vld [vmem:[%s488_s1 + $0x14] ss:$8 sps:$4 sm:$0xff]  }
   0x2   :  { %113 = vmatprep.subr.bf16.mxu0 %v354_v0  ;;  %346 = vmatprep.subr.bf16.mxu1 %v354_v0  ;;  %v359_v4 = vld [vmem:[%s488_s1 + $0x10] ss:$8 sps:$4 sm:$0xff]   ;;  %v360_v5 = vld [vmem:[%s487_s0] sm:$0xff]  }
   0x3   :  { %114 = vmatpush1.bf16.msra.mxu0 %v356_v1  ;;  %348 = vmatpush1.bf16.msra.mxu1 %v356_v1  ;;  %v361_v6 = vld [vmem:[%s487_s0 + $0x18] sm:$0xff]  }
   0x4   :  { %115 = vmatprep.subr.bf16.mxu0 %v357_v3  ;;  %347 = vmatprep.subr.bf16.mxu1 %v357_v3 }
   0x7   :  { %116 = vmatpush1.bf16.msra.mxu0 %v359_v4  ;;  %349 = vmatpush1.bf16.msra.mxu1 %v359_v4 }
   0x8   :  { %8 = vsyncpa [#allocation3], 0  ;;  %v362_v7 = vld [vmem:[%s487_s0 + $0x8] sm:$0xff]   ;;  %v363_v8 = vld [vmem:[%s487_s0 + $0x20] sm:$0xff]   ;;  %v34_v11 = vlaneseq }
   0x9   :  { %v364_v9 = vld [vmem:[%s487_s0 + $0x10] sm:$0xff]   ;;  %v365_v10 = vld [vmem:[%s487_s0 + $0x28] sm:$0xff]   ;;  %v32_v14 = vld [vmem:[%s489_s2] sm:$0x3]  ;;  %s391_s0 = smov [#allocation2]  }
   0xa   :  { %316 = vmatmul.mubr.msk.bf16.vlgmr.msra.gmra.mrb[0].mxu0 %vm94_vm0, %v360_v5  ;;  %319 = vmatmul.mubr.msk.bf16.vlgmr.msra.gmra.mrb[0].mxu1 %vm94_vm0, %v361_v6  ;;  %v35_v12 = vshrl.u32 %v34_v11, 7  ;;  %s295_s2 = sshll.u32 %s391_s0, 4  ;;  %s296_s2 = int_to_ptr.vmem [resolvable:$true] %s295_s2 }
   0xb   :  { %155 = vmatprep.mubr.bf16.mxu0 %v390_v2  ;;  %185 = vmatprep.mubr.bf16.mxu1 %v390_v2  ;;  %s366_s6 = scalar_lea.vmem %s296_s2, 1536  ;;  %p371_p1 = scmp.lt.s32.totalorder %s296_s2, %s296_s2 }
   0xc   :  { %v36_v13 = vsub.s32 0, %v35_v12  ;;  %v40_v15 = vsub.s32 1, %v35_v12  ;;  %p367_p0 = scmp.ne.s32.totalorder %s296_s2, %s366_s6  ;;  %p372_p2 = scmp.lt.s32.totalorder %s366_s6, %s366_s6 }
   0xe   :  { %v447_v16 = vrot.slane %v32_v14, %v36_v13  ;;  %v449_v17 = vrot.slane %v32_v14, %v40_v15  ;;  %p373_p3 = por %p372_p2, %p371_p1 }
  0x10   :  { %p374_p4 = pnand %p373_p3, %p367_p0 }
  0x12   :  { %317 = vmatmul.mubr.msk.bf16.gmra.mrb[4].mxu0 %vm94_vm0, %v362_v7  ;;  %320 = vmatmul.mubr.msk.bf16.gmra.mrb[4].mxu1 %vm94_vm0, %v363_v8 }
  0x13   :  { %165 = vmatprep.mubr.bf16.mxu0 %v390_v2  ;;  %195 = vmatprep.mubr.bf16.mxu1 %v390_v2 }
  0x1a   :  { %318 = vmatmul.mubr.msk.bf16.gmra.mrb[8].mxu0 %vm94_vm0, %v364_v9  ;;  %321 = vmatmul.mubr.msk.bf16.gmra.mrb[8].mxu1 %vm94_vm0, %v365_v10 }
  0xdd   :  { %v147_v18 = vpop.f32.mrb[0].mxu0  ;;  %v177_v19 = vpop.f32.mrb[0].mxu1 }
  0xde   :  { %v148_v20 = vadd.f32 %v147_v18, %v447_v16  ;;  %v178_v21 = vadd.f32 %v177_v19, %v447_v16  ;;  %v149_v22 = vpop.f32.mrb[1].mxu0  ;;  %v179_v23 = vpop.f32.mrb[1].mxu1 }
  0xdf   :  { %v150_v24 = vadd.f32 %v149_v22, %v449_v17  ;;  %v180_v25 = vadd.f32 %v179_v23, %v449_v17  ;;  %v151_v26 = vpop.f32.mrb[2].mxu0  ;;  %v181_v27 = vpop.f32.mrb[2].mxu1 }
  0xe0   :  { %v152_v28 = vadd.f32 %v151_v26, %v447_v16  ;;  %v182_v29 = vadd.f32 %v181_v27, %v447_v16  ;;  %v153_v30 = vpop.f32.mrb[3].mxu0  ;;  %v183_v31 = vpop.f32.mrb[3].mxu1 }
  0xe1   :  { %v334_v32 = vpack.c.bf16 %v150_v24, %v148_v20  ;;  %v340_v33 = vpack.c.bf16 %v180_v25, %v178_v21  ;;  %v154_v34 = vadd.f32 %v153_v30, %v449_v17  ;;  %v184_v35 = vadd.f32 %v183_v31, %v449_v17 }
  0xe3   :  { %278 = vst [vmem:[#allocation2] sm:$0xff] %v334_v32  ;;  %284 = vst [vmem:[#allocation2 + $0x30] sm:$0xff] %v340_v33  ;;  %v335_v36 = vpack.c.bf16 %v154_v34, %v152_v28  ;;  %v341_v37 = vpack.c.bf16 %v184_v35, %v182_v29 }
  0xe5   :  { %279 = vst [vmem:[#allocation2 + $0x8] sm:$0xff] %v335_v36  ;;  %285 = vst [vmem:[#allocation2 + $0x38] sm:$0xff] %v341_v37  ;;  %v157_v38 = vpop.f32.mrb[4].mxu0  ;;  %v187_v39 = vpop.f32.mrb[4].mxu1 }
  0xe6   :  { %v158_v40 = vadd.f32 %v157_v38, %v447_v16  ;;  %v188_v41 = vadd.f32 %v187_v39, %v447_v16  ;;  %v159_v42 = vpop.f32.mrb[5].mxu0  ;;  %v189_v43 = vpop.f32.mrb[5].mxu1 }
  0xe7   :  { %v160_v44 = vadd.f32 %v159_v42, %v449_v17  ;;  %v190_v45 = vadd.f32 %v189_v43, %v449_v17  ;;  %v161_v46 = vpop.f32.mrb[6].mxu0  ;;  %v191_v47 = vpop.f32.mrb[6].mxu1 }
  0xe8   :  { %v162_v48 = vadd.f32 %v161_v46, %v447_v16  ;;  %v192_v49 = vadd.f32 %v191_v47, %v447_v16  ;;  %v163_v50 = vpop.f32.mrb[7].mxu0  ;;  %v193_v51 = vpop.f32.mrb[7].mxu1 }
  0xe9   :  { %v336_v52 = vpack.c.bf16 %v160_v44, %v158_v40  ;;  %v342_v53 = vpack.c.bf16 %v190_v45, %v188_v41  ;;  %v164_v54 = vadd.f32 %v163_v50, %v449_v17  ;;  %v194_v55 = vadd.f32 %v193_v51, %v449_v17 }
  0xeb   :  { %280 = vst [vmem:[#allocation2 + $0x10] sm:$0xff] %v336_v52  ;;  %286 = vst [vmem:[#allocation2 + $0x40] sm:$0xff] %v342_v53  ;;  %v337_v56 = vpack.c.bf16 %v164_v54, %v162_v48  ;;  %v343_v57 = vpack.c.bf16 %v194_v55, %v192_v49 }
  0xed   :  { %281 = vst [vmem:[#allocation2 + $0x18] sm:$0xff] %v337_v56  ;;  %287 = vst [vmem:[#allocation2 + $0x48] sm:$0xff] %v343_v57  ;;  %v167_v58 = vpop.f32.mrb[8].mxu0  ;;  %v197_v59 = vpop.f32.mrb[8].mxu1 }
  0xee   :  { %v168_v60 = vadd.f32 %v167_v58, %v447_v16  ;;  %v198_v61 = vadd.f32 %v197_v59, %v447_v16  ;;  %v169_v62 = vpop.f32.mrb[9].mxu0  ;;  %v199_v63 = vpop.f32.mrb[9].mxu1 }
  0xef   :  { %v170_v0 = vadd.f32 %v169_v62, %v449_v17  ;;  %v200_v1 = vadd.f32 %v199_v63, %v449_v17  ;;  %v171_v2 = vpop.f32.mrb[10].mxu0  ;;  %v201_v3 = vpop.f32.mrb[10].mxu1 }
  0xf0   :  { %v172_v4 = vadd.f32 %v171_v2, %v447_v16  ;;  %v202_v5 = vadd.f32 %v201_v3, %v447_v16  ;;  %v173_v6 = vpop.f32.mrb[11].mxu0  ;;  %v203_v7 = vpop.f32.mrb[11].mxu1 }
  0xf1   :  { %v338_v8 = vpack.c.bf16 %v170_v0, %v168_v60  ;;  %v344_v9 = vpack.c.bf16 %v200_v1, %v198_v61  ;;  %v174_v10 = vadd.f32 %v173_v6, %v449_v17  ;;  %v204_v11 = vadd.f32 %v203_v7, %v449_v17 }
  0xf3   :  { %282 = vst [vmem:[#allocation2 + $0x20] sm:$0xff] %v338_v8  ;;  %288 = vst [vmem:[#allocation2 + $0x50] sm:$0xff] %v344_v9  ;;  %v339_v12 = vpack.c.bf16 %v174_v10, %v172_v4  ;;  %v345_v13 = vpack.c.bf16 %v204_v11, %v202_v5 }
  0xf5   :  { %283 = vst [vmem:[#allocation2 + $0x28] sm:$0xff] %v339_v12  ;;  %289 = vst [vmem:[#allocation2 + $0x58] sm:$0xff] %v345_v13 }
  0xf6   :  { %377 = shalt.err (!%p374_p4)
}
  0xf7   :  { %s378_s9 = scalar_lea.hbm %s490_s3, 1536 }
  0xf8   :  { %p379_p5 = scmp.ne.s32.totalorder %s490_s3, %s378_s9  ;;  %p382_p6 = scmp.lt.u32.totalorder %s378_s9, %s490_s3 }
  0xfa   :  { %p384_p7 = pnand %p382_p6, %p379_p5 }
  0xfc   :  { %387 = shalt.err (!%p384_p7)
}
  0xfd   :  { %s392_s14 = smov 128   ;;  %s393_s15 = smov 8  }
  0xfe   :  { %301 = dma.vmem_to_hbm [thread:$0]  %s296_s2, 1536, %s490_s3, [#allocation3], %s392_s14, %s392_s14, %s393_s15  }
  0xff   :  { %388 = dma.done.wait [#allocation3], 1536  }
 0x100   :  { %389 = vsyncadd [#allocation3], 4294965760 }
 0x101   :  { %305 = vsyncpa [#allocation3], 1 }

</bundles_post_ra>
